<compile_context>
chip_gen: v6e
topology: v6e:2x2x1
jax: 0.10.0
libtpu: 0.0.40
codegen_flags: <defaults>
</compile_context>

<pallas_src>
import functools

import numpy as np
import jax
import jax.numpy as jnp
from jax import lax
from jax.experimental import pallas as pl
from jax.experimental.pallas import tpu as pltpu

_ROW_GROUP = 8      # rows (B*C images) processed together by the stats kernel
_NCOARSE = 16       # two-level binning: 16 coarse x 16 fine = 256 bins
_NFINE = 16


def _otsu_stats_kernel(minmax_ref, x_ref, macc_ref, *, nbins):
    """Accumulate per-row two-level histograms into the output count matrix.

    minmax_ref: (2,)       f32 SMEM  -- global [min, max] of the whole tensor.
    x_ref:      (8, TN)    VMEM      -- lane-dense pixel chunk for 8 rows (native dtype).
    macc_ref:   (128, 128) f32 VMEM  -- output count accumulator; entry [8c+r, 8f+r] is the
                                        count of pixels of row r in bin 16c+f.
    """
    nc_idx = pl.program_id(1)

    @pl.when(nc_idx == 0)
    def _init():
        macc_ref[...] = jnp.zeros_like(macc_ref)

    mn = minmax_ref[0]
    mx = minmax_ref[1]
    denom = mx - mn
    scale = jnp.where(denom > 0.0, jnp.float32(nbins) / denom, jnp.float32(0.0))

    # --- per-pixel bin index, lane-dense on the (8, TN) block (torch.histc semantics) ------
    # NOTE: pixels exactly on interior bin edges can land one bin off vs torch.histc because
    # this uses f32 (x-mn)*scale + floor instead of edge comparisons.
    x = x_ref[...].astype(jnp.float32)
    bin_idx = jnp.clip(jnp.floor((x - mn) * scale), 0.0, float(nbins - 1))   # 0..255
    coarse = jnp.floor(bin_idx * (1.0 / _NFINE))                             # 0..15
    fine = bin_idx - coarse * _NFINE                                         # 0..15

    # --- two-level one-hots in bf16 (0/1 exact): 16 + 16 lane-dense compares per pixel ------
    # Row layout of both one-hots: index i = 8*bin + row.
    coarse_oh = jnp.concatenate(
        [(coarse == float(c)).astype(jnp.bfloat16) for c in range(_NCOARSE)], axis=0)  # (128, TN)
    fine_oh = jnp.concatenate(
        [(fine == float(f)).astype(jnp.bfloat16) for f in range(_NFINE)], axis=0)      # (128, TN)

    # --- joint (coarse x fine) counts for all 8 rows with one transpose-free MXU matmul -----
    # M[8c+r1, 8f+r2] = #pixels n with coarse[r1,n]==c and fine[r2,n]==f; only r1==r2 is used.
    macc_ref[...] += lax.dot_general(
        coarse_oh, fine_oh,
        dimension_numbers=(((1,), (1,)), ((), ())),      # A . B^T, contraction on pixel axis
        preferred_element_type=jnp.float32)


def _apply_kernel(thr_ref, x_ref, o_ref):
    """Zero pixels <= their row's threshold.

    thr_ref: (RA, 1)  f32 VMEM   -- per-row thresholds (broadcast over lanes).
    x_ref:   (RA, TN) VMEM       -- native dtype.
    o_ref:   (RA, TN) VMEM       -- native dtype.
    """
    x = x_ref[...]
    thr = thr_ref[...].astype(x.dtype)                   # (RA, 1) broadcast column
    o_ref[...] = jnp.where(x <= thr, jnp.zeros_like(x), x)


def _pick_tile(n, cap, bytes_per_col=None, vmem_cap=None):
    """Largest power-of-two tile (>=128, <=cap) dividing n, optionally VMEM-capped."""
    for cand in (8192, 4096, 2048, 1024, 512, 256, 128):
        if cand > cap or n % cand != 0:
            continue
        if bytes_per_col is not None and vmem_cap is not None and cand * bytes_per_col > vmem_cap:
            continue
        return cand
    return 128


def _otsu_select(hist_counts, mn, mx, nbins):
    """Plain-JAX Otsu threshold selection from per-row bin counts (rows, nbins) -> (rows,) f32."""
    hist = hist_counts / jnp.sum(hist_counts, axis=1, keepdims=True)
    t_val = jnp.arange(nbins, dtype=jnp.float32)[None, :]

    weight_bg = jnp.cumsum(hist, axis=1)
    sum_bg = jnp.cumsum(hist * t_val, axis=1)
    total = jnp.sum(hist * t_val, axis=1, keepdims=True)
    sum_fg = total - sum_bg
    weight_fg = 1.0 - weight_bg

    valid = jnp.logical_and(weight_bg != 0.0, weight_fg != 0.0)
    mean_bg = sum_bg / jnp.where(weight_bg == 0.0, 1.0, weight_bg)
    mean_fg = sum_fg / jnp.where(weight_fg == 0.0, 1.0, weight_fg)
    var = weight_bg * weight_fg * (mean_bg - mean_fg) ** 2
    var = jnp.where(valid, var, -jnp.inf)

    # First t attaining the maximum (mirrors the sequential strictly-greater update).
    vmax = jnp.max(var, axis=1, keepdims=True)
    first_t = jnp.min(jnp.where(var == vmax, t_val, jnp.float32(nbins)), axis=1)

    # threshold = bin_edges[t + 1], bin_edges = linspace(mn, mx, nbins) (kornia quirk).
    step = (mx - mn) / jnp.float32(nbins - 1)
    edge_i = jnp.minimum(first_t + 1.0, jnp.float32(nbins - 1))
    thr = mn + edge_i * step
    any_valid = jnp.any(valid, axis=1)
    return jnp.where(any_valid, thr, jnp.float32(0.0))


@functools.partial(jax.jit, static_argnames=("nbins",))
def otsu_threshold(x: jax.Array, nbins: int = 256):
    """JAX/Pallas port of kornia OtsuThreshold.forward for 4D NCHW float inputs.

    Returns (x_thresholded, thresholds) with thresholds of shape (B*C,) in x.dtype.
    """
    assert x.ndim == 4, "this port handles 4D NCHW inputs"
    assert nbins == _NCOARSE * _NFINE, "kernel is specialized for nbins == 256"
    b, c, h, w = x.shape
    rows = b * c
    n = h * w
    assert n % 128 == 0, "H*W must be a multiple of 128"
    itemsize = x.dtype.itemsize

    x2d = x.reshape(rows, n)                                 # native dtype, no HBM copy

    # Global min / max: one mem-bound XLA pass (multi-output fused under jit), SMEM scalars.
    mn = jnp.min(x2d).astype(jnp.float32)
    mx = jnp.max(x2d).astype(jnp.float32)
    minmax = jnp.stack([mn, mx])                             # (2,) f32

    # ---- stats kernel: tiled over pixels, 8 rows per group ------------------------------
    rg = _ROW_GROUP
    g = pl.cdiv(rows, rg)
    rows_pad = g * rg
    # TODO(synk): for rows % 8 != 0 this pads the whole tensor in HBM; a masked ragged-tail
    #             group would avoid the extra read+write (padded rows are simply discarded).
    x_stats = x2d if rows_pad == rows else jnp.pad(x2d, ((0, rows_pad - rows), (0, 0)))

    tn_stats = _pick_tile(n, cap=8192)
    grid_stats = (g, n // tn_stats)

    flops = 2 * g * n * (rg * _NCOARSE) * (rg * _NFINE) + rows_pad * n * (_NCOARSE + _NFINE)
    macc = pl.pallas_call(
        functools.partial(_otsu_stats_kernel, nbins=nbins),
        out_shape=jax.ShapeDtypeStruct((g * rg * _NCOARSE, rg * _NFINE), jnp.float32),
        grid=grid_stats,
        in_specs=[
            pl.BlockSpec(memory_space=pltpu.MemorySpace.SMEM),          # [min, max]
            pl.BlockSpec((rg, tn_stats), lambda gi, ci: (gi, ci)),      # pixel chunk
        ],
        out_specs=pl.BlockSpec((rg * _NCOARSE, rg * _NFINE), lambda gi, ci: (gi, 0)),
        compiler_params=pltpu.CompilerParams(
            dimension_semantics=("parallel", "arbitrary"),
            vmem_limit_bytes=32 * 1024 * 1024),
        cost_estimate=pl.CostEstimate(
            flops=int(flops), transcendentals=0,
            bytes_accessed=int(rows_pad * n * itemsize
                               + g * rg * _NCOARSE * rg * _NFINE * 4)),
    )(minmax, x_stats)

    # ---- unpack per-row 256-bin histograms from the joint count matrices (plain JAX) ----
    # hist[group*8 + r, 16c + f] = macc_group[8c + r, 8f + r]
    m5 = macc.reshape(g, _NCOARSE, rg, _NFINE, rg)
    diag = jnp.diagonal(m5, axis1=2, axis2=4)                # (g, ncoarse, nfine, rg)
    hist_counts = jnp.transpose(diag, (0, 3, 1, 2)).reshape(rows_pad, nbins)[:rows]

    thr_f32 = _otsu_select(hist_counts, mn, mx, nbins)       # (rows,) f32

    # ---- apply kernel: mem-bound, 2-D grid, broadcast threshold column, native dtype ----
    ra = rg if rows % rg == 0 else rows
    tn_apply = _pick_tile(n, cap=8192, bytes_per_col=ra * itemsize, vmem_cap=2 * 1024 * 1024)
    thr_col = thr_f32.reshape(rows, 1)

    x_out2d = pl.pallas_call(
        _apply_kernel,
        out_shape=jax.ShapeDtypeStruct((rows, n), x.dtype),
        grid=(rows // ra, n // tn_apply),
        in_specs=[
            pl.BlockSpec((ra, 1), lambda i, j: (i, 0)),                  # thresholds column
            pl.BlockSpec((ra, tn_apply), lambda i, j: (i, j)),
        ],
        out_specs=pl.BlockSpec((ra, tn_apply), lambda i, j: (i, j)),
        compiler_params=pltpu.CompilerParams(
            dimension_semantics=("parallel", "parallel"),
            vmem_limit_bytes=16 * 1024 * 1024),
    )(thr_col, x2d)

    return x_out2d.reshape(x.shape), thr_f32.astype(x.dtype)


def _otsu_reference_numpy(x_np: np.ndarray, nbins: int = 256) -> np.ndarray:
    """float64 numpy reference mirroring the PyTorch loop (thresholds only)."""
    b, c, h, w = x_np.shape
    rows = x_np.reshape(b * c, h * w).astype(np.float64)
    mn, mx = rows.min(), rows.max()
    edges = np.linspace(mn, mx, nbins)
    thrs = np.zeros(rows.shape[0], dtype=np.float64)
    for i, r in enumerate(rows):
        hist, _ = np.histogram(r, bins=nbins, range=(mn, mx))
        hist = hist / hist.sum()
        max_var, opt = -1.0, 0.0
        sum_bg = weight_bg = 0.0
        sum_fg = float(np.sum(hist * np.arange(nbins)))
        for t in range(nbins):
            bin_value = t * hist[t]
            sum_bg += bin_value
            weight_bg += hist[t]
            sum_fg -= bin_value
            weight_fg = 1.0 - weight_bg
            if weight_bg == 0 or weight_fg == 0:
                continue
            mean_bg = sum_bg / weight_bg
            mean_fg = sum_fg / weight_fg
            var = weight_bg * weight_fg * (mean_bg - mean_fg) ** 2
            if var > max_var:
                max_var, opt = var, edges[min(t + 1, nbins - 1)]
        thrs[i] = opt
    return thrs


if __name__ == "__main__":
    key = jax.random.PRNGKey(0)
    x = jax.random.uniform(key, (2, 4, 16, 16), dtype=jnp.float32)

    x_out, thresholds = otsu_threshold(x, nbins=256)
    x_out = jax.block_until_ready(x_out)
    thresholds = jax.block_until_ready(thresholds)

    # Shape / dtype checks.
    assert x_out.shape == x.shape and x_out.dtype == x.dtype
    assert thresholds.shape == (2 * 4,) and bool(jnp.all(jnp.isfinite(thresholds)))

    # The apply kernel must equal where(x <= thr, 0, x) exactly (same dtype ops).
    thr_col = thresholds.reshape(8, 1)
    ref_apply = jnp.where(x.reshape(8, 256) <= thr_col, 0.0, x.reshape(8, 256)).reshape(x.shape)
    assert jnp.array_equal(x_out, ref_apply)

    # Threshold values vs a float64 numpy reference of the torch loop; allow a few bins of
    # slack since f32 binning / cumulative sums can flip near-ties on a flat variance plateau.
    ref_thr = _otsu_reference_numpy(np.asarray(x), nbins=256)
    bin_step = float((x.max() - x.min()) / 255.0)
    assert np.allclose(np.asarray(thresholds, dtype=np.float64), ref_thr, atol=5.0 * bin_step)

    print("KERNEL_OK")
</pallas_src>

<mosaic_0001>
module attributes {stable_mosaic.version = 11 : i64} {
  func.func @_otsu_stats_kernel(%arg0: i32, %arg1: i32, %arg2: memref<2xf32, #tpu.memory_space<smem>>, %arg3: memref<8x256xf32, #tpu.memory_space<vmem>>, %arg4: memref<128x128xf32, #tpu.memory_space<vmem>>) attributes {dimension_semantics = [#tpu.dimension_semantics<parallel>, #tpu.dimension_semantics<arbitrary>], iteration_bounds = array<i64: 1, 1>, scalar_prefetch = 0 : i64, scratch_operands = 0 : i64, tpu.core_type = #tpu.core_type<tc>, window_params = [{transform_indices = @transform_0, window_bounds = array<i64: 2>}, {transform_indices = @transform_1, window_bounds = array<i64: 8, 256>}, {transform_indices = @transform_2, window_bounds = array<i64: 128, 128>}]} {
    %c0_i32 = arith.constant 0 : i32
    %0 = arith.cmpi eq, %arg1, %c0_i32 : i32
    %1 = arith.extui %0 : i1 to i32
    %c0_i32_0 = arith.constant 0 : i32
    %2 = arith.cmpi ne, %1, %c0_i32_0 : i32
    scf.if %2 {
      %cst_46 = arith.constant 0.000000e+00 : f32
      %191 = vector.broadcast %cst_46 : f32 to vector<128x128xf32>
      %c0_47 = arith.constant 0 : index
      %c0_48 = arith.constant 0 : index
      %192 = vector.load %arg4[%c0_47, %c0_48] : memref<128x128xf32, #tpu.memory_space<vmem>>, vector<128x128xf32>
      tpu.vector_store %arg4[%c0_47, %c0_48], %191 {strides = array<i32>} : memref<128x128xf32, #tpu.memory_space<vmem>>, vector<128x128xf32>,
    } else {
    }
    %c0 = arith.constant 0 : index
    %3 = memref.load %arg2[%c0] : memref<2xf32, #tpu.memory_space<smem>>
    %c1 = arith.constant 1 : index
    %4 = memref.load %arg2[%c1] : memref<2xf32, #tpu.memory_space<smem>>
    %5 = arith.subf %4, %3 : f32
    %cst = arith.constant 0.000000e+00 : f32
    %6 = arith.cmpf ogt, %5, %cst : f32
    %cst_1 = arith.constant 2.560000e+02 : f32
    %7 = arith.divf %cst_1, %5 : f32
    %cst_2 = arith.constant 0.000000e+00 : f32
    %8 = arith.select %6, %7, %cst_2 : f32
    %c0_3 = arith.constant 0 : index
    %c0_4 = arith.constant 0 : index
    %9 = vector.load %arg3[%c0_3, %c0_4] : memref<8x256xf32, #tpu.memory_space<vmem>>, vector<8x256xf32>
    %10 = vector.broadcast %3 : f32 to vector<8x256xf32>
    %11 = arith.subf %9, %10 : vector<8x256xf32>
    %12 = vector.broadcast %8 : f32 to vector<8x256xf32>
    %13 = arith.mulf %11, %12 : vector<8x256xf32>
    %14 = math.floor %13 : vector<8x256xf32>
    %cst_5 = arith.constant 0.000000e+00 : f32
    %cst_6 = arith.constant 2.550000e+02 : f32
    %15 = vector.broadcast %cst_5 : f32 to vector<8x256xf32>
    %16 = arith.maximumf %15, %14 : vector<8x256xf32>
    %17 = vector.broadcast %cst_6 : f32 to vector<8x256xf32>
    %18 = arith.minimumf %17, %16 : vector<8x256xf32>
    %cst_7 = arith.constant 6.250000e-02 : f32
    %19 = vector.broadcast %cst_7 : f32 to vector<8x256xf32>
    %20 = arith.mulf %18, %19 : vector<8x256xf32>
    %21 = math.floor %20 : vector<8x256xf32>
    %cst_8 = arith.constant 1.600000e+01 : f32
    %22 = vector.broadcast %cst_8 : f32 to vector<8x256xf32>
    %23 = arith.mulf %21, %22 : vector<8x256xf32>
    %24 = arith.subf %18, %23 : vector<8x256xf32>
    %cst_9 = arith.constant 0.000000e+00 : f32
    %25 = vector.broadcast %cst_9 : f32 to vector<8x256xf32>
    %26 = arith.cmpf oeq, %21, %25 : vector<8x256xf32>
    %27 = arith.extui %26 : vector<8x256xi1> to vector<8x256xi32>
    %28 = arith.sitofp %27 : vector<8x256xi32> to vector<8x256xf32>
    %29 = arith.truncf %28 : vector<8x256xf32> to vector<8x256xbf16>
    %cst_10 = arith.constant 1.000000e+00 : f32
    %30 = vector.broadcast %cst_10 : f32 to vector<8x256xf32>
    %31 = arith.cmpf oeq, %21, %30 : vector<8x256xf32>
    %32 = arith.extui %31 : vector<8x256xi1> to vector<8x256xi32>
    %33 = arith.sitofp %32 : vector<8x256xi32> to vector<8x256xf32>
    %34 = arith.truncf %33 : vector<8x256xf32> to vector<8x256xbf16>
    %cst_11 = arith.constant 2.000000e+00 : f32
    %35 = vector.broadcast %cst_11 : f32 to vector<8x256xf32>
    %36 = arith.cmpf oeq, %21, %35 : vector<8x256xf32>
    %37 = arith.extui %36 : vector<8x256xi1> to vector<8x256xi32>
    %38 = arith.sitofp %37 : vector<8x256xi32> to vector<8x256xf32>
    %39 = arith.truncf %38 : vector<8x256xf32> to vector<8x256xbf16>
    %cst_12 = arith.constant 3.000000e+00 : f32
    %40 = vector.broadcast %cst_12 : f32 to vector<8x256xf32>
    %41 = arith.cmpf oeq, %21, %40 : vector<8x256xf32>
    %42 = arith.extui %41 : vector<8x256xi1> to vector<8x256xi32>
    %43 = arith.sitofp %42 : vector<8x256xi32> to vector<8x256xf32>
    %44 = arith.truncf %43 : vector<8x256xf32> to vector<8x256xbf16>
    %cst_13 = arith.constant 4.000000e+00 : f32
    %45 = vector.broadcast %cst_13 : f32 to vector<8x256xf32>
    %46 = arith.cmpf oeq, %21, %45 : vector<8x256xf32>
    %47 = arith.extui %46 : vector<8x256xi1> to vector<8x256xi32>
    %48 = arith.sitofp %47 : vector<8x256xi32> to vector<8x256xf32>
    %49 = arith.truncf %48 : vector<8x256xf32> to vector<8x256xbf16>
    %cst_14 = arith.constant 5.000000e+00 : f32
    %50 = vector.broadcast %cst_14 : f32 to vector<8x256xf32>
    %51 = arith.cmpf oeq, %21, %50 : vector<8x256xf32>
    %52 = arith.extui %51 : vector<8x256xi1> to vector<8x256xi32>
    %53 = arith.sitofp %52 : vector<8x256xi32> to vector<8x256xf32>
    %54 = arith.truncf %53 : vector<8x256xf32> to vector<8x256xbf16>
    %cst_15 = arith.constant 6.000000e+00 : f32
    %55 = vector.broadcast %cst_15 : f32 to vector<8x256xf32>
    %56 = arith.cmpf oeq, %21, %55 : vector<8x256xf32>
    %57 = arith.extui %56 : vector<8x256xi1> to vector<8x256xi32>
    %58 = arith.sitofp %57 : vector<8x256xi32> to vector<8x256xf32>
    %59 = arith.truncf %58 : vector<8x256xf32> to vector<8x256xbf16>
    %cst_16 = arith.constant 7.000000e+00 : f32
    %60 = vector.broadcast %cst_16 : f32 to vector<8x256xf32>
    %61 = arith.cmpf oeq, %21, %60 : vector<8x256xf32>
    %62 = arith.extui %61 : vector<8x256xi1> to vector<8x256xi32>
    %63 = arith.sitofp %62 : vector<8x256xi32> to vector<8x256xf32>
    %64 = arith.truncf %63 : vector<8x256xf32> to vector<8x256xbf16>
    %cst_17 = arith.constant 8.000000e+00 : f32
    %65 = vector.broadcast %cst_17 : f32 to vector<8x256xf32>
    %66 = arith.cmpf oeq, %21, %65 : vector<8x256xf32>
    %67 = arith.extui %66 : vector<8x256xi1> to vector<8x256xi32>
    %68 = arith.sitofp %67 : vector<8x256xi32> to vector<8x256xf32>
    %69 = arith.truncf %68 : vector<8x256xf32> to vector<8x256xbf16>
    %cst_18 = arith.constant 9.000000e+00 : f32
    %70 = vector.broadcast %cst_18 : f32 to vector<8x256xf32>
    %71 = arith.cmpf oeq, %21, %70 : vector<8x256xf32>
    %72 = arith.extui %71 : vector<8x256xi1> to vector<8x256xi32>
    %73 = arith.sitofp %72 : vector<8x256xi32> to vector<8x256xf32>
    %74 = arith.truncf %73 : vector<8x256xf32> to vector<8x256xbf16>
    %cst_19 = arith.constant 1.000000e+01 : f32
    %75 = vector.broadcast %cst_19 : f32 to vector<8x256xf32>
    %76 = arith.cmpf oeq, %21, %75 : vector<8x256xf32>
    %77 = arith.extui %76 : vector<8x256xi1> to vector<8x256xi32>
    %78 = arith.sitofp %77 : vector<8x256xi32> to vector<8x256xf32>
    %79 = arith.truncf %78 : vector<8x256xf32> to vector<8x256xbf16>
    %cst_20 = arith.constant 1.100000e+01 : f32
    %80 = vector.broadcast %cst_20 : f32 to vector<8x256xf32>
    %81 = arith.cmpf oeq, %21, %80 : vector<8x256xf32>
    %82 = arith.extui %81 : vector<8x256xi1> to vector<8x256xi32>
    %83 = arith.sitofp %82 : vector<8x256xi32> to vector<8x256xf32>
    %84 = arith.truncf %83 : vector<8x256xf32> to vector<8x256xbf16>
    %cst_21 = arith.constant 1.200000e+01 : f32
    %85 = vector.broadcast %cst_21 : f32 to vector<8x256xf32>
    %86 = arith.cmpf oeq, %21, %85 : vector<8x256xf32>
    %87 = arith.extui %86 : vector<8x256xi1> to vector<8x256xi32>
    %88 = arith.sitofp %87 : vector<8x256xi32> to vector<8x256xf32>
    %89 = arith.truncf %88 : vector<8x256xf32> to vector<8x256xbf16>
    %cst_22 = arith.constant 1.300000e+01 : f32
    %90 = vector.broadcast %cst_22 : f32 to vector<8x256xf32>
    %91 = arith.cmpf oeq, %21, %90 : vector<8x256xf32>
    %92 = arith.extui %91 : vector<8x256xi1> to vector<8x256xi32>
    %93 = arith.sitofp %92 : vector<8x256xi32> to vector<8x256xf32>
    %94 = arith.truncf %93 : vector<8x256xf32> to vector<8x256xbf16>
    %cst_23 = arith.constant 1.400000e+01 : f32
    %95 = vector.broadcast %cst_23 : f32 to vector<8x256xf32>
    %96 = arith.cmpf oeq, %21, %95 : vector<8x256xf32>
    %97 = arith.extui %96 : vector<8x256xi1> to vector<8x256xi32>
    %98 = arith.sitofp %97 : vector<8x256xi32> to vector<8x256xf32>
    %99 = arith.truncf %98 : vector<8x256xf32> to vector<8x256xbf16>
    %cst_24 = arith.constant 1.500000e+01 : f32
    %100 = vector.broadcast %cst_24 : f32 to vector<8x256xf32>
    %101 = arith.cmpf oeq, %21, %100 : vector<8x256xf32>
    %102 = arith.extui %101 : vector<8x256xi1> to vector<8x256xi32>
    %103 = arith.sitofp %102 : vector<8x256xi32> to vector<8x256xf32>
    %104 = arith.truncf %103 : vector<8x256xf32> to vector<8x256xbf16>
    %105 = tpu.concatenate %29, %34, %39, %44, %49, %54, %59, %64, %69, %74, %79, %84, %89, %94, %99, %104 in 0 : vector<8x256xbf16>, vector<8x256xbf16>, vector<8x256xbf16>, vector<8x256xbf16>, vector<8x256xbf16>, vector<8x256xbf16>, vector<8x256xbf16>, vector<8x256xbf16>, vector<8x256xbf16>, vector<8x256xbf16>, vector<8x256xbf16>, vector<8x256xbf16>, vector<8x256xbf16>, vector<8x256xbf16>, vector<8x256xbf16>, vector<8x256xbf16> -> vector<128x256xbf16>
    %cst_25 = arith.constant 0.000000e+00 : f32
    %106 = vector.broadcast %cst_25 : f32 to vector<8x256xf32>
    %107 = arith.cmpf oeq, %24, %106 : vector<8x256xf32>
    %108 = arith.extui %107 : vector<8x256xi1> to vector<8x256xi32>
    %109 = arith.sitofp %108 : vector<8x256xi32> to vector<8x256xf32>
    %110 = arith.truncf %109 : vector<8x256xf32> to vector<8x256xbf16>
    %cst_26 = arith.constant 1.000000e+00 : f32
    %111 = vector.broadcast %cst_26 : f32 to vector<8x256xf32>
    %112 = arith.cmpf oeq, %24, %111 : vector<8x256xf32>
    %113 = arith.extui %112 : vector<8x256xi1> to vector<8x256xi32>
    %114 = arith.sitofp %113 : vector<8x256xi32> to vector<8x256xf32>
    %115 = arith.truncf %114 : vector<8x256xf32> to vector<8x256xbf16>
    %cst_27 = arith.constant 2.000000e+00 : f32
    %116 = vector.broadcast %cst_27 : f32 to vector<8x256xf32>
    %117 = arith.cmpf oeq, %24, %116 : vector<8x256xf32>
    %118 = arith.extui %117 : vector<8x256xi1> to vector<8x256xi32>
    %119 = arith.sitofp %118 : vector<8x256xi32> to vector<8x256xf32>
    %120 = arith.truncf %119 : vector<8x256xf32> to vector<8x256xbf16>
    %cst_28 = arith.constant 3.000000e+00 : f32
    %121 = vector.broadcast %cst_28 : f32 to vector<8x256xf32>
    %122 = arith.cmpf oeq, %24, %121 : vector<8x256xf32>
    %123 = arith.extui %122 : vector<8x256xi1> to vector<8x256xi32>
    %124 = arith.sitofp %123 : vector<8x256xi32> to vector<8x256xf32>
    %125 = arith.truncf %124 : vector<8x256xf32> to vector<8x256xbf16>
    %cst_29 = arith.constant 4.000000e+00 : f32
    %126 = vector.broadcast %cst_29 : f32 to vector<8x256xf32>
    %127 = arith.cmpf oeq, %24, %126 : vector<8x256xf32>
    %128 = arith.extui %127 : vector<8x256xi1> to vector<8x256xi32>
    %129 = arith.sitofp %128 : vector<8x256xi32> to vector<8x256xf32>
    %130 = arith.truncf %129 : vector<8x256xf32> to vector<8x256xbf16>
    %cst_30 = arith.constant 5.000000e+00 : f32
    %131 = vector.broadcast %cst_30 : f32 to vector<8x256xf32>
    %132 = arith.cmpf oeq, %24, %131 : vector<8x256xf32>
    %133 = arith.extui %132 : vector<8x256xi1> to vector<8x256xi32>
    %134 = arith.sitofp %133 : vector<8x256xi32> to vector<8x256xf32>
    %135 = arith.truncf %134 : vector<8x256xf32> to vector<8x256xbf16>
    %cst_31 = arith.constant 6.000000e+00 : f32
    %136 = vector.broadcast %cst_31 : f32 to vector<8x256xf32>
    %137 = arith.cmpf oeq, %24, %136 : vector<8x256xf32>
    %138 = arith.extui %137 : vector<8x256xi1> to vector<8x256xi32>
    %139 = arith.sitofp %138 : vector<8x256xi32> to vector<8x256xf32>
    %140 = arith.truncf %139 : vector<8x256xf32> to vector<8x256xbf16>
    %cst_32 = arith.constant 7.000000e+00 : f32
    %141 = vector.broadcast %cst_32 : f32 to vector<8x256xf32>
    %142 = arith.cmpf oeq, %24, %141 : vector<8x256xf32>
    %143 = arith.extui %142 : vector<8x256xi1> to vector<8x256xi32>
    %144 = arith.sitofp %143 : vector<8x256xi32> to vector<8x256xf32>
    %145 = arith.truncf %144 : vector<8x256xf32> to vector<8x256xbf16>
    %cst_33 = arith.constant 8.000000e+00 : f32
    %146 = vector.broadcast %cst_33 : f32 to vector<8x256xf32>
    %147 = arith.cmpf oeq, %24, %146 : vector<8x256xf32>
    %148 = arith.extui %147 : vector<8x256xi1> to vector<8x256xi32>
    %149 = arith.sitofp %148 : vector<8x256xi32> to vector<8x256xf32>
    %150 = arith.truncf %149 : vector<8x256xf32> to vector<8x256xbf16>
    %cst_34 = arith.constant 9.000000e+00 : f32
    %151 = vector.broadcast %cst_34 : f32 to vector<8x256xf32>
    %152 = arith.cmpf oeq, %24, %151 : vector<8x256xf32>
    %153 = arith.extui %152 : vector<8x256xi1> to vector<8x256xi32>
    %154 = arith.sitofp %153 : vector<8x256xi32> to vector<8x256xf32>
    %155 = arith.truncf %154 : vector<8x256xf32> to vector<8x256xbf16>
    %cst_35 = arith.constant 1.000000e+01 : f32
    %156 = vector.broadcast %cst_35 : f32 to vector<8x256xf32>
    %157 = arith.cmpf oeq, %24, %156 : vector<8x256xf32>
    %158 = arith.extui %157 : vector<8x256xi1> to vector<8x256xi32>
    %159 = arith.sitofp %158 : vector<8x256xi32> to vector<8x256xf32>
    %160 = arith.truncf %159 : vector<8x256xf32> to vector<8x256xbf16>
    %cst_36 = arith.constant 1.100000e+01 : f32
    %161 = vector.broadcast %cst_36 : f32 to vector<8x256xf32>
    %162 = arith.cmpf oeq, %24, %161 : vector<8x256xf32>
    %163 = arith.extui %162 : vector<8x256xi1> to vector<8x256xi32>
    %164 = arith.sitofp %163 : vector<8x256xi32> to vector<8x256xf32>
    %165 = arith.truncf %164 : vector<8x256xf32> to vector<8x256xbf16>
    %cst_37 = arith.constant 1.200000e+01 : f32
    %166 = vector.broadcast %cst_37 : f32 to vector<8x256xf32>
    %167 = arith.cmpf oeq, %24, %166 : vector<8x256xf32>
    %168 = arith.extui %167 : vector<8x256xi1> to vector<8x256xi32>
    %169 = arith.sitofp %168 : vector<8x256xi32> to vector<8x256xf32>
    %170 = arith.truncf %169 : vector<8x256xf32> to vector<8x256xbf16>
    %cst_38 = arith.constant 1.300000e+01 : f32
    %171 = vector.broadcast %cst_38 : f32 to vector<8x256xf32>
    %172 = arith.cmpf oeq, %24, %171 : vector<8x256xf32>
    %173 = arith.extui %172 : vector<8x256xi1> to vector<8x256xi32>
    %174 = arith.sitofp %173 : vector<8x256xi32> to vector<8x256xf32>
    %175 = arith.truncf %174 : vector<8x256xf32> to vector<8x256xbf16>
    %cst_39 = arith.constant 1.400000e+01 : f32
    %176 = vector.broadcast %cst_39 : f32 to vector<8x256xf32>
    %177 = arith.cmpf oeq, %24, %176 : vector<8x256xf32>
    %178 = arith.extui %177 : vector<8x256xi1> to vector<8x256xi32>
    %179 = arith.sitofp %178 : vector<8x256xi32> to vector<8x256xf32>
    %180 = arith.truncf %179 : vector<8x256xf32> to vector<8x256xbf16>
    %cst_40 = arith.constant 1.500000e+01 : f32
    %181 = vector.broadcast %cst_40 : f32 to vector<8x256xf32>
    %182 = arith.cmpf oeq, %24, %181 : vector<8x256xf32>
    %183 = arith.extui %182 : vector<8x256xi1> to vector<8x256xi32>
    %184 = arith.sitofp %183 : vector<8x256xi32> to vector<8x256xf32>
    %185 = arith.truncf %184 : vector<8x256xf32> to vector<8x256xbf16>
    %186 = tpu.concatenate %110, %115, %120, %125, %130, %135, %140, %145, %150, %155, %160, %165, %170, %175, %180, %185 in 0 : vector<8x256xbf16>, vector<8x256xbf16>, vector<8x256xbf16>, vector<8x256xbf16>, vector<8x256xbf16>, vector<8x256xbf16>, vector<8x256xbf16>, vector<8x256xbf16>, vector<8x256xbf16>, vector<8x256xbf16>, vector<8x256xbf16>, vector<8x256xbf16>, vector<8x256xbf16>, vector<8x256xbf16>, vector<8x256xbf16>, vector<8x256xbf16> -> vector<128x256xbf16>
    %c0_41 = arith.constant 0 : index
    %c0_42 = arith.constant 0 : index
    %187 = vector.load %arg4[%c0_41, %c0_42] : memref<128x128xf32, #tpu.memory_space<vmem>>, vector<128x128xf32>
    %cst_43 = arith.constant dense<0.000000e+00> : vector<128x128xf32>
    %188 = tpu.matmul %105, %186, %cst_43 {dimension_numbers = #tpu.dot_dimension_numbers<[1], [1], [0], [0], [0, 0, 1, 0], [], []>} : vector<128x256xbf16>, vector<128x256xbf16>, vector<128x128xf32> -> vector<128x128xf32>
    %189 = arith.addf %187, %188 : vector<128x128xf32>
    %c0_44 = arith.constant 0 : index
    %c0_45 = arith.constant 0 : index
    %190 = vector.load %arg4[%c0_44, %c0_45] : memref<128x128xf32, #tpu.memory_space<vmem>>, vector<128x128xf32>
    tpu.vector_store %arg4[%c0_44, %c0_45], %189 {strides = array<i32>} : memref<128x128xf32, #tpu.memory_space<vmem>>, vector<128x128xf32>,
    return
  }
  func.func @transform_0(%arg0: i32, %arg1: i32) -> i32 {
    %c0_i32 = arith.constant 0 : i32
    %c0_i32_0 = arith.constant 0 : i32
    return %c0_i32 : i32
  }
  func.func @transform_1(%arg0: i32, %arg1: i32) -> (i32, i32) {
    %c0_i32 = arith.constant 0 : i32
    return %arg0, %arg1 : i32, i32
  }
  func.func @transform_2(%arg0: i32, %arg1: i32) -> (i32, i32) {
    %c0_i32 = arith.constant 0 : i32
    %c0_i32_0 = arith.constant 0 : i32
    return %arg0, %c0_i32 : i32, i32
  }
}

module attributes {stable_mosaic.version = 11 : i64} {
  func.func @_apply_kernel(%arg0: i32, %arg1: i32, %arg2: memref<8x1xf32, #tpu.memory_space<vmem>>, %arg3: memref<8x256xf32, #tpu.memory_space<vmem>>, %arg4: memref<8x256xf32, #tpu.memory_space<vmem>>) attributes {dimension_semantics = [#tpu.dimension_semantics<parallel>, #tpu.dimension_semantics<parallel>], iteration_bounds = array<i64: 1, 1>, scalar_prefetch = 0 : i64, scratch_operands = 0 : i64, tpu.core_type = #tpu.core_type<tc>, window_params = [{transform_indices = @transform_0, window_bounds = array<i64: 8, 1>}, {transform_indices = @transform_1, window_bounds = array<i64: 8, 256>}, {transform_indices = @transform_2, window_bounds = array<i64: 8, 256>}]} {
    %c0 = arith.constant 0 : index
    %c0_0 = arith.constant 0 : index
    %0 = vector.load %arg3[%c0, %c0_0] : memref<8x256xf32, #tpu.memory_space<vmem>>, vector<8x256xf32>
    %c0_1 = arith.constant 0 : index
    %c0_2 = arith.constant 0 : index
    %1 = vector.load %arg2[%c0_1, %c0_2] : memref<8x1xf32, #tpu.memory_space<vmem>>, vector<8x1xf32>
    %2 = vector.broadcast %1 : vector<8x1xf32> to vector<8x256xf32>
    %3 = arith.cmpf ole, %0, %2 : vector<8x256xf32>
    %cst = arith.constant 0.000000e+00 : f32
    %4 = vector.broadcast %cst : f32 to vector<8x256xf32>
    %5 = arith.select %3, %4, %0 : vector<8x256xi1>, vector<8x256xf32>
    %c0_3 = arith.constant 0 : index
    %c0_4 = arith.constant 0 : index
    %6 = vector.load %arg4[%c0_3, %c0_4] : memref<8x256xf32, #tpu.memory_space<vmem>>, vector<8x256xf32>
    tpu.vector_store %arg4[%c0_3, %c0_4], %5 {strides = array<i32>} : memref<8x256xf32, #tpu.memory_space<vmem>>, vector<8x256xf32>,
    return
  }
  func.func @transform_0(%arg0: i32, %arg1: i32) -> (i32, i32) {
    %c0_i32 = arith.constant 0 : i32
    %c0_i32_0 = arith.constant 0 : i32
    return %arg0, %c0_i32 : i32, i32
  }
  func.func @transform_1(%arg0: i32, %arg1: i32) -> (i32, i32) {
    %c0_i32 = arith.constant 0 : i32
    return %arg0, %arg1 : i32, i32
  }
  func.func @transform_2(%arg0: i32, %arg1: i32) -> (i32, i32) {
    %c0_i32 = arith.constant 0 : i32
    return %arg0, %arg1 : i32, i32
  }
}

</mosaic_0001>

<bundles_post_ra>
// kernel: otsu_threshold.2
= control target key start
LH: loop header
LB: loop body
LE: loop exit
PB: predicated region body
PF: predicated region fallthrough
CT: control target
= control target key end

     0   :  { %7 = vsyncpa [#allocation3], 0  ;;  %s1067_s0 = inlined_call_operand.vmem [shape: f32[2], index: 0, kind: input, shape index: {}]   ;;  %s1068_s1 = inlined_call_operand.vmem [shape: f32[8,256], index: 1, kind: input, shape index: {}]   ;;  %s1069_s2 = inlined_call_operand.vmem [shape: f32[128,128], index: 2, kind: output, shape index: {}]  }
   0x1   :  { %s14_s11 = sshll.u32 %s1067_s0, 4  ;;  %s15_s11 = int_to_ptr.vmem [resolvable:$true] %s14_s11 }
   0x2   :  { %s762_s12 = scalar_lea.vmem %s15_s11, 16  ;;  %p767_p1 = scmp.lt.s32.totalorder %s15_s11, %s15_s11 }
   0x3   :  { %p763_p0 = scmp.ne.s32.totalorder %s15_s11, %s762_s12  ;;  %p768_p2 = scmp.lt.s32.totalorder %s762_s12, %s762_s12 }
   0x5   :  { %p769_p3 = por %p768_p2, %p767_p1 }
   0x7   :  { %p770_p4 = pnand %p769_p3, %p763_p0 }
   0x9   :  { %773 = shalt.err (!%p770_p4)
}
   0xa   :  { %s776_s13 = smov [#allocation2]  }
   0xb   :  { %17 = dma.vmem_to_smem %s15_s11, 16, %s776_s13, [#allocation3]  }
   0xc   :  { %774 = dma.done.wait [#allocation3], 16  }
   0xd   :  { %775 = vsyncadd [#allocation3], 4294967280 }
   0xe   :  { %23 = sfence }
   0xf   :  { %s45_s14 = sld [smem:[#allocation2]]  ;;  %v54_v2 = vld [vmem:[%s1068_s1] sm:$0xff]  ;;  %v55_v3 = vld [vmem:[%s1068_s1 + $0x8] sm:$0xff]  ;;  %v777_v22 = vmov 0.0   ;;  %vm236_vm4 = vcmask 1043456  }
  0x10   :  { %s675_s15 = sld [smem:[#allocation2 + $0x1]] }
  0x15   :  { %v56_v4 = vstv %s45_s14 }
  0x16   :  { %s47_s16 = ssub.f32 %s675_s15, %s45_s14  ;;  %v57_v5 = vsub.f32 %v54_v2, %v56_v4  ;;  %v58_v6 = vsub.f32 %v55_v3, %v56_v4 }
  0x18   :  { %v49_v0 = vstv %s47_s16  ;;  %p48_p5 = scmp.gt.f32.partialorder %s47_s16, 0.0 }
  0x19   :  { %760 = vrcp.f32 %v49_v0 }
  0x26   :  { %v761_v1 = vpop.eup %760 }
  0x27   :  { %756 = vpush %v761_v1 }
  0x58   :  { %s757_s20 = spop %756 }
  0x59   :  { %s52_s21 = smul.f32 256.0, %s757_s20 }
  0x5b   :  { %s1071_s21 = smov (!%p48_p5, %s52_s21), 0.0 }
  0x5c   :  { %v59_v7 = vstv %s1071_s21 }
  0x5d   :  { %v60_v8 = vmul.f32 %v59_v7, %v57_v5  ;;  %v61_v9 = vmul.f32 %v59_v7, %v58_v6 }
  0x5f   :  { %v62_v10 = vfloor.f32 %v60_v8  ;;  %v63_v11 = vfloor.f32 %v61_v9 }
  0x61   :  { %v64_v12 = vmax.f32 %v62_v10, 0.0  ;;  %v65_v13 = vmax.f32 %v63_v11, 0.0 }
  0x63   :  { %v66_v14 = vmin.f32 %v64_v12, 255.0  ;;  %v67_v15 = vmin.f32 %v65_v13, 255.0 }
  0x65   :  { %v68_v16 = vmul.f32 0.0625, %v66_v14  ;;  %v69_v17 = vmul.f32 0.0625, %v67_v15 }
  0x67   :  { %v802_v18 = vfloor.f32 %v68_v16  ;;  %v804_v19 = vfloor.f32 %v69_v17 }
  0x69   :  { %v72_v20 = vmul.f32 16.0, %v802_v18  ;;  %v73_v21 = vmul.f32 16.0, %v804_v19  ;;  %vm77_vm0 = vcmp.eq.f32.partialorder %v804_v19, 0.0  ;;  %vm85_vm1 = vcmp.eq.f32.partialorder %v804_v19, 1.0 }
  0x6a   :  { %v677_v23 = vsel %vm77_vm0, 1.0, %v777_v22  ;;  %v679_v24 = vsel %vm85_vm1, 1.0, %v777_v22  ;;  %vm141_vm2 = vcmp.eq.f32.partialorder %v804_v19, 8.0  ;;  %vm149_vm3 = vcmp.eq.f32.partialorder %v804_v19, 9.0 }
  0x6b   :  { %v814_v25 = vsub.f32 %v66_v14, %v72_v20  ;;  %v816_v26 = vsub.f32 %v67_v15, %v73_v21  ;;  %v91_v27 = vpack.c.bf16 %v679_v24, %v679_v24  ;;  %v693_v28 = vsel %vm141_vm2, 1.0, %v777_v22 }
  0x6c   :  { %v695_v29 = vsel %vm149_vm3, 1.0, %v777_v22  ;;  %v83_v30 = vpack.c.bf16 %v677_v23, %v677_v23  ;;  %v147_v33 = vpack.c.bf16 %v693_v28, %v693_v28 }
  0x6d   :  { %v207_v31 = vrot.slane %v91_v27, 4  ;;  %v155_v32 = vpack.c.bf16 %v695_v29, %v695_v29  ;;  %vm414_vm5 = vcmp.eq.f32.partialorder %v816_v26, 14.0  ;;  %vm422_vm6 = vcmp.eq.f32.partialorder %v816_v26, 15.0 }
  0x6e   :  { %vm413_vm7 = vcmp.eq.f32.partialorder %v814_v25, 14.0  ;;  %vm421_vm8 = vcmp.eq.f32.partialorder %v814_v25, 15.0  ;;  %v737_v36 = vsel %vm414_vm5, 1.0, %v777_v22  ;;  %v739_v37 = vsel %vm422_vm6, 1.0, %v777_v22 }
  0x6f   :  { %v243_v34 = vsel %vm236_vm4, %v83_v30, %v207_v31  ;;  %v223_v35 = vrot.slane %v155_v32, 4  ;;  %v428_v38 = vpack.c.bf16 %v739_v37, %v739_v37  ;;  %v736_v39 = vsel %vm413_vm7, 1.0, %v777_v22 }
  0x70   :  { %573 = vmatprep.mubr.bf16.mxu0 %v243_v34  ;;  %v738_v40 = vsel %vm421_vm8, 1.0, %v777_v22  ;;  %vm398_vm9 = vcmp.eq.f32.partialorder %v816_v26, 12.0  ;;  %v420_v44 = vpack.c.bf16 %v737_v36, %v737_v36  ;;  %v419_v46 = vpack.c.bf16 %v736_v39, %v736_v39 }
  0x71   :  { %v275_v41 = vsel %vm236_vm4, %v147_v33, %v223_v35  ;;  %v427_v42 = vpack.c.bf16 %v738_v40, %v738_v40  ;;  %v733_v43 = vsel %vm398_vm9, 1.0, %v777_v22  ;;  %v460_v45 = vrot.slane %v428_v38, 4 }
  0x72   :  { %605 = vmatprep.mubr.bf16.mxu1 %v275_v41  ;;  %vm406_vm10 = vcmp.eq.f32.partialorder %v816_v26, 13.0  ;;  %vm397_vm11 = vcmp.eq.f32.partialorder %v814_v25, 12.0  ;;  %vm405_vm12 = vcmp.eq.f32.partialorder %v814_v25, 13.0  ;;  %v404_v50 = vpack.c.bf16 %v733_v43, %v733_v43 }
  0x73   :  { %v459_v47 = vrot.slane %v427_v42, 4  ;;  %v735_v48 = vsel %vm406_vm10, 1.0, %v777_v22  ;;  %v523_v49 = vsel %vm236_vm4, %v420_v44, %v460_v45  ;;  %v734_v52 = vsel %vm405_vm12, 1.0, %v777_v22 }
  0x74   :  { %v412_v51 = vpack.c.bf16 %v735_v48, %v735_v48  ;;  %541 = vmatprep.subr.bf16.mxu0 %v523_v49  ;;  %740 = vmatprep.subr.bf16.mxu1 %v523_v49  ;;  %v411_v54 = vpack.c.bf16 %v734_v52, %v734_v52  ;;  %vm382_vm13 = vcmp.eq.f32.partialorder %v816_v26, 10.0  ;;  %vm390_vm14 = vcmp.eq.f32.partialorder %v816_v26, 11.0 }
  0x75   :  { %v519_v53 = vsel %vm236_vm4, %v419_v46, %v459_v47  ;;  %v732_v56 = vsel %vm397_vm11, 1.0, %v777_v22  ;;  %v729_v57 = vsel %vm382_vm13, 1.0, %v777_v22  ;;  %v731_v58 = vsel %vm390_vm14, 1.0, %v777_v22 }
  0x76   :  { %542 = vmatpush1.bf16.xpose.msra.mxu0 %v519_v53  ;;  %748 = vmatpush1.bf16.xpose.msra.mxu1 %v519_v53  ;;  %v456_v55 = vrot.slane %v412_v51, 4  ;;  %v455_v59 = vrot.slane %v411_v54, 4  ;;  %v396_v60 = vpack.c.bf16 %v731_v58, %v731_v58  ;;  %vm381_vm15 = vcmp.eq.f32.partialorder %v814_v25, 10.0 }
  0x77   :  { %vm389_vm0 = vcmp.eq.f32.partialorder %v814_v25, 11.0  ;;  %v403_v62 = vpack.c.bf16 %v732_v56, %v732_v56  ;;  %v388_v63 = vpack.c.bf16 %v729_v57, %v729_v57  ;;  %vm366_vm1 = vcmp.eq.f32.partialorder %v816_v26, 8.0 }
  0x78   :  { %v515_v61 = vsel %vm236_vm4, %v404_v50, %v456_v55  ;;  %v730_v0 = vsel %vm389_vm0, 1.0, %v777_v22  ;;  %v452_v1 = vrot.slane %v396_v60, 4  ;;  %vm374_vm2 = vcmp.eq.f32.partialorder %v816_v26, 9.0 }
  0x79   :  { %543 = vmatprep.subr.bf16.mxu0 %v515_v61  ;;  %741 = vmatprep.subr.bf16.mxu1 %v515_v61  ;;  %v395_v2 = vpack.c.bf16 %v730_v0, %v730_v0  ;;  %vm365_vm3 = vcmp.eq.f32.partialorder %v814_v25, 8.0  ;;  %v511_v3 = vsel %vm236_vm4, %v403_v62, %v455_v59  ;;  %v728_v4 = vsel %vm381_vm15, 1.0, %v777_v22 }
  0x7a   :  { %v727_v5 = vsel %vm374_vm2, 1.0, %v777_v22  ;;  %vm373_vm5 = vcmp.eq.f32.partialorder %v814_v25, 9.0  ;;  %v725_v6 = vsel %vm366_vm1, 1.0, %v777_v22  ;;  %v724_v8 = vsel %vm365_vm3, 1.0, %v777_v22 }
  0x7b   :  { %v380_v7 = vpack.c.bf16 %v727_v5, %v727_v5  ;;  %v726_v9 = vsel %vm373_vm5, 1.0, %v777_v22  ;;  %v451_v10 = vrot.slane %v395_v2, 4  ;;  %vm350_vm6 = vcmp.eq.f32.partialorder %v816_v26, 6.0 }
  0x7c   :  { %v379_v11 = vpack.c.bf16 %v726_v9, %v726_v9  ;;  %vm358_vm7 = vcmp.eq.f32.partialorder %v816_v26, 7.0  ;;  %v507_v12 = vsel %vm236_vm4, %v388_v63, %v452_v1  ;;  %v387_v14 = vpack.c.bf16 %v728_v4, %v728_v4 }
  0x7d   :  { %v723_v13 = vsel %vm358_vm7, 1.0, %v777_v22  ;;  %v448_v15 = vrot.slane %v380_v7, 4  ;;  %v721_v16 = vsel %vm350_vm6, 1.0, %v777_v22  ;;  %vm349_vm8 = vcmp.eq.f32.partialorder %v814_v25, 6.0 }
  0x7e   :  { %544 = vmatpush1.bf16.xpose.msra.mxu0 %v511_v3  ;;  %749 = vmatpush1.bf16.xpose.msra.mxu1 %v511_v3  ;;  %v372_v17 = vpack.c.bf16 %v725_v6, %v725_v6  ;;  %v371_v20 = vpack.c.bf16 %v724_v8, %v724_v8  ;;  %v364_v21 = vpack.c.bf16 %v723_v13, %v723_v13  ;;  %vm357_vm9 = vcmp.eq.f32.partialorder %v814_v25, 7.0 }
  0x7f   :  { %545 = vmatprep.subr.bf16.mxu0 %v507_v12  ;;  %742 = vmatprep.subr.bf16.mxu1 %v507_v12  ;;  %v503_v23 = vsel %vm236_vm4, %v387_v14, %v451_v10  ;;  %v447_v24 = vrot.slane %v379_v11, 4  ;;  %v722_v27 = vsel %vm357_vm9, 1.0, %v777_v22  ;;  %vm334_vm10 = vcmp.eq.f32.partialorder %v816_v26, 4.0 }
  0x80   :  { %v356_v28 = vpack.c.bf16 %v721_v16, %v721_v16  ;;  %v720_v29 = vsel %vm349_vm8, 1.0, %v777_v22  ;;  %v363_v30 = vpack.c.bf16 %v722_v27, %v722_v27  ;;  %vm342_vm11 = vcmp.eq.f32.partialorder %v816_v26, 5.0 }
  0x81   :  { %vm76_vm12 = vcmp.eq.f32.partialorder %v802_v18, 0.0  ;;  %vm84_vm13 = vcmp.eq.f32.partialorder %v802_v18, 1.0  ;;  %v499_v31 = vsel %vm236_vm4, %v372_v17, %v448_v15  ;;  %v719_v32 = vsel %vm342_vm11, 1.0, %v777_v22 }
  0x82   :  { %vm333_vm14 = vcmp.eq.f32.partialorder %v814_v25, 4.0  ;;  %vm341_vm15 = vcmp.eq.f32.partialorder %v814_v25, 5.0  ;;  %v444_v33 = vrot.slane %v364_v21, 4  ;;  %v717_v34 = vsel %vm334_vm10, 1.0, %v777_v22 }
  0x83   :  { %v348_v35 = vpack.c.bf16 %v719_v32, %v719_v32  ;;  %v718_v36 = vsel %vm341_vm15, 1.0, %v777_v22  ;;  %v355_v37 = vpack.c.bf16 %v720_v29, %v720_v29  ;;  %v443_v38 = vrot.slane %v363_v30, 4 }
  0x84   :  { %vm318_vm0 = vcmp.eq.f32.partialorder %v816_v26, 2.0  ;;  %vm326_vm1 = vcmp.eq.f32.partialorder %v816_v26, 3.0  ;;  %v716_v39 = vsel %vm333_vm14, 1.0, %v777_v22  ;;  %v347_v40 = vpack.c.bf16 %v718_v36, %v718_v36 }
  0x85   :  { %v715_v41 = vsel %vm326_vm1, 1.0, %v777_v22  ;;  %vm317_vm2 = vcmp.eq.f32.partialorder %v814_v25, 2.0  ;;  %v495_v42 = vsel %vm236_vm4, %v371_v20, %v447_v24  ;;  %v340_v43 = vpack.c.bf16 %v717_v34, %v717_v34 }
  0x86   :  { %546 = vmatpush1.bf16.xpose.msra.mxu0 %v503_v23  ;;  %750 = vmatpush1.bf16.xpose.msra.mxu1 %v503_v23  ;;  %v713_v44 = vsel %vm318_vm0, 1.0, %v777_v22  ;;  %v332_v45 = vpack.c.bf16 %v715_v41, %v715_v41  ;;  %v491_v46 = vsel %vm236_vm4, %v356_v28, %v444_v33  ;;  %v440_v47 = vrot.slane %v348_v35, 4 }
  0x87   :  { %547 = vmatprep.subr.bf16.mxu0 %v499_v31  ;;  %743 = vmatprep.subr.bf16.mxu1 %v499_v31  ;;  %vm325_vm3 = vcmp.eq.f32.partialorder %v814_v25, 3.0  ;;  %vm302_vm5 = vcmp.eq.f32.partialorder %v816_v26, 0.0  ;;  %v487_v48 = vsel %vm236_vm4, %v355_v37, %v443_v38  ;;  %v339_v49 = vpack.c.bf16 %v716_v39, %v716_v39 }
  0x88   :  { %v712_v50 = vsel %vm317_vm2, 1.0, %v777_v22  ;;  %v714_v51 = vsel %vm325_vm3, 1.0, %v777_v22  ;;  %v439_v52 = vrot.slane %v347_v40, 4  ;;  %v324_v53 = vpack.c.bf16 %v713_v44, %v713_v44 }
  0x89   :  { %v331_v54 = vpack.c.bf16 %v714_v51, %v714_v51  ;;  %vm310_vm6 = vcmp.eq.f32.partialorder %v816_v26, 1.0  ;;  %v436_v55 = vrot.slane %v332_v45, 4  ;;  %v709_v56 = vsel %vm302_vm5, 1.0, %v777_v22 }
  0x8a   :  { %v711_v57 = vsel %vm310_vm6, 1.0, %v777_v22  ;;  %vm309_vm7 = vcmp.eq.f32.partialorder %v814_v25, 1.0  ;;  %v483_v58 = vsel %vm236_vm4, %v340_v43, %v440_v47  ;;  %v323_v59 = vpack.c.bf16 %v712_v50, %v712_v50 }
  0x8b   :  { %v316_v60 = vpack.c.bf16 %v711_v57, %v711_v57  ;;  %v897_v61 = vsel %vm309_vm7, 1.0, %v777_v22  ;;  %v435_v62 = vrot.slane %v331_v54, 4  ;;  %v676_v63 = vsel %vm76_vm12, 1.0, %v777_v22 }
  0x8c   :  { %v678_v26 = vsel %vm84_vm13, 1.0, %v777_v22  ;;  %vm140_vm8 = vcmp.eq.f32.partialorder %v802_v18, 8.0  ;;  %v907_v0 = vsel %vm236_vm4, %v339_v49, %v439_v52  ;;  %v308_v1 = vpack.c.bf16 %v709_v56, %v709_v56 }
  0x8d   :  { %v432_v2 = vrot.slane %v316_v60, 4  ;;  %v90_v3 = vpack.c.bf16 %v678_v26, %v678_v26  ;;  %v910_v4 = vsel %vm236_vm4, %v324_v53, %v436_v55  ;;  %v315_v5 = vpack.c.bf16 %v897_v61, %v897_v61 }
  0x8e   :  { %548 = vmatpush1.bf16.xpose.msra.mxu0 %v495_v42  ;;  %751 = vmatpush1.bf16.xpose.msra.mxu1 %v495_v42  ;;  %vm148_vm9 = vcmp.eq.f32.partialorder %v802_v18, 9.0  ;;  %vm93_vm10 = vcmp.eq.f32.partialorder %v804_v19, 2.0  ;;  %v82_v6 = vpack.c.bf16 %v676_v63, %v676_v63  ;;  %v692_v8 = vsel %vm140_vm8, 1.0, %v777_v22 }
  0x8f   :  { %549 = vmatprep.subr.bf16.mxu0 %v491_v46  ;;  %744 = vmatprep.subr.bf16.mxu1 %v491_v46  ;;  %v206_v7 = vrot.slane %v90_v3, 4  ;;  %v694_v9 = vsel %vm148_vm9, 1.0, %v777_v22  ;;  %v919_v10 = vsel %vm236_vm4, %v323_v59, %v435_v62  ;;  %v922_v11 = vsel %vm236_vm4, %v308_v1, %v432_v2 }
  0x90   :  { %v154_v12 = vpack.c.bf16 %v694_v9, %v694_v9  ;;  %vm101_vm11 = vcmp.eq.f32.partialorder %v804_v19, 3.0  ;;  %v681_v14 = vsel %vm93_vm10, 1.0, %v777_v22  ;;  %vm157_vm12 = vcmp.eq.f32.partialorder %v804_v19, 10.0 }
  0x91   :  { %v926_v13 = vsel %vm236_vm4, %v82_v6, %v206_v7  ;;  %v683_v15 = vsel %vm101_vm11, 1.0, %v777_v22  ;;  %v146_v16 = vpack.c.bf16 %v692_v8, %v692_v8  ;;  %vm165_vm13 = vcmp.eq.f32.partialorder %v804_v19, 11.0 }
  0x92   :  { %v222_v17 = vrot.slane %v154_v12, 4  ;;  %v107_v20 = vpack.c.bf16 %v683_v15, %v683_v15  ;;  %v697_v21 = vsel %vm157_vm12, 1.0, %v777_v22  ;;  %v699_v23 = vsel %vm165_vm13, 1.0, %v777_v22 }
  0x93   :  { %vm92_vm14 = vcmp.eq.f32.partialorder %v802_v18, 2.0  ;;  %vm100_vm15 = vcmp.eq.f32.partialorder %v802_v18, 3.0  ;;  %v99_v27 = vpack.c.bf16 %v681_v14, %v681_v14  ;;  %v171_v29 = vpack.c.bf16 %v699_v23, %v699_v23 }
  0x94   :  { %v937_v24 = vsel %vm236_vm4, %v146_v16, %v222_v17  ;;  %v211_v28 = vrot.slane %v107_v20, 4  ;;  %v680_v30 = vsel %vm92_vm14, 1.0, %v777_v22  ;;  %v682_v31 = vsel %vm100_vm15, 1.0, %v777_v22 }
  0x95   :  { %vm156_vm0 = vcmp.eq.f32.partialorder %v802_v18, 10.0  ;;  %vm164_vm1 = vcmp.eq.f32.partialorder %v802_v18, 11.0  ;;  %v163_v33 = vpack.c.bf16 %v697_v21, %v697_v21  ;;  %v227_v34 = vrot.slane %v171_v29, 4 }
  0x96   :  { %550 = vmatpush1.bf16.xpose.msra.mxu0 %v487_v48  ;;  %752 = vmatpush1.bf16.xpose.msra.mxu1 %v487_v48  ;;  %v944_v32 = vsel %vm236_vm4, %v99_v27, %v211_v28  ;;  %v106_v35 = vpack.c.bf16 %v682_v31, %v682_v31  ;;  %v696_v36 = vsel %vm156_vm0, 1.0, %v777_v22  ;;  %v698_v37 = vsel %vm164_vm1, 1.0, %v777_v22 }
  0x97   :  { %551 = vmatprep.subr.bf16.mxu0 %v483_v58  ;;  %745 = vmatprep.subr.bf16.mxu1 %v483_v58  ;;  %vm109_vm2 = vcmp.eq.f32.partialorder %v804_v19, 4.0  ;;  %vm117_vm3 = vcmp.eq.f32.partialorder %v804_v19, 5.0  ;;  %v951_v38 = vsel %vm236_vm4, %v163_v33, %v227_v34  ;;  %v98_v39 = vpack.c.bf16 %v680_v30, %v680_v30 }
  0x98   :  { %v210_v40 = vrot.slane %v106_v35, 4  ;;  %v170_v41 = vpack.c.bf16 %v698_v37, %v698_v37  ;;  %v685_v42 = vsel %vm109_vm2, 1.0, %v777_v22  ;;  %v687_v43 = vsel %vm117_vm3, 1.0, %v777_v22 }
  0x99   :  { %vm173_vm5 = vcmp.eq.f32.partialorder %v804_v19, 12.0  ;;  %vm181_vm6 = vcmp.eq.f32.partialorder %v804_v19, 13.0  ;;  %v162_v45 = vpack.c.bf16 %v696_v36, %v696_v36  ;;  %v123_v47 = vpack.c.bf16 %v687_v43, %v687_v43 }
  0x9a   :  { %v958_v44 = vsel %vm236_vm4, %v98_v39, %v210_v40  ;;  %v226_v46 = vrot.slane %v170_v41, 4  ;;  %v701_v48 = vsel %vm173_vm5, 1.0, %v777_v22  ;;  %v703_v49 = vsel %vm181_vm6, 1.0, %v777_v22 }
  0x9b   :  { %vm108_vm7 = vcmp.eq.f32.partialorder %v802_v18, 4.0  ;;  %vm116_vm8 = vcmp.eq.f32.partialorder %v802_v18, 5.0  ;;  %vm301_vm9 = vcmp.eq.f32.partialorder %v814_v25, 0.0  ;;  %v115_v51 = vpack.c.bf16 %v685_v42, %v685_v42 }
  0x9c   :  { %v966_v50 = vsel %vm236_vm4, %v162_v45, %v226_v46  ;;  %v215_v52 = vrot.slane %v123_v47, 4  ;;  %v187_v53 = vpack.c.bf16 %v703_v49, %v703_v49  ;;  %v684_v54 = vsel %vm108_vm7, 1.0, %v777_v22 }
  0x9d   :  { %v686_v55 = vsel %vm116_vm8, 1.0, %v777_v22  ;;  %vm172_vm10 = vcmp.eq.f32.partialorder %v802_v18, 12.0  ;;  %vm180_vm11 = vcmp.eq.f32.partialorder %v802_v18, 13.0  ;;  %v179_v57 = vpack.c.bf16 %v701_v48, %v701_v48 }
  0x9e   :  { %552 = vmatpush1.bf16.xpose.msra.mxu0 %v907_v0  ;;  %753 = vmatpush1.bf16.xpose.msra.mxu1 %v907_v0  ;;  %v259_v56 = vsel %vm236_vm4, %v115_v51, %v215_v52  ;;  %v231_v58 = vrot.slane %v187_v53, 4  ;;  %v122_v59 = vpack.c.bf16 %v686_v55, %v686_v55  ;;  %v700_v60 = vsel %vm172_vm10, 1.0, %v777_v22 }
  0x9f   :  { %553 = vmatprep.subr.bf16.mxu0 %v910_v4  ;;  %746 = vmatprep.subr.bf16.mxu1 %v910_v4  ;;  %v702_v62 = vsel %vm180_vm11, 1.0, %v777_v22  ;;  %vm125_vm12 = vcmp.eq.f32.partialorder %v804_v19, 6.0  ;;  %vm133_vm13 = vcmp.eq.f32.partialorder %v804_v19, 7.0  ;;  %v114_v26 = vpack.c.bf16 %v684_v54, %v684_v54 }
  0xa0   :  { %v291_v63 = vsel %vm236_vm4, %v179_v57, %v231_v58  ;;  %v214_v0 = vrot.slane %v122_v59, 4  ;;  %v186_v1 = vpack.c.bf16 %v702_v62, %v702_v62  ;;  %v689_v2 = vsel %vm125_vm12, 1.0, %v777_v22 }
  0xa1   :  { %v691_v3 = vsel %vm133_vm13, 1.0, %v777_v22  ;;  %vm189_vm14 = vcmp.eq.f32.partialorder %v804_v19, 14.0  ;;  %vm197_vm15 = vcmp.eq.f32.partialorder %v804_v19, 15.0  ;;  %v178_v6 = vpack.c.bf16 %v700_v60, %v700_v60 }
  0xa2   :  { %v255_v4 = vsel %vm236_vm4, %v114_v26, %v214_v0  ;;  %v230_v7 = vrot.slane %v186_v1, 4  ;;  %v139_v8 = vpack.c.bf16 %v691_v3, %v691_v3  ;;  %v705_v9 = vsel %vm189_vm14, 1.0, %v777_v22 }
  0xa3   :  { %v707_v12 = vsel %vm197_vm15, 1.0, %v777_v22  ;;  %vm124_vm0 = vcmp.eq.f32.partialorder %v802_v18, 6.0  ;;  %vm132_vm1 = vcmp.eq.f32.partialorder %v802_v18, 7.0  ;;  %v131_v15 = vpack.c.bf16 %v689_v2, %v689_v2 }
  0xa4   :  { %v287_v14 = vsel %vm236_vm4, %v178_v6, %v230_v7  ;;  %v219_v16 = vrot.slane %v139_v8, 4  ;;  %v203_v17 = vpack.c.bf16 %v707_v12, %v707_v12  ;;  %v688_v19 = vsel %vm124_vm0, 1.0, %v777_v22 }
  0xa5   :  { %v690_v20 = vsel %vm132_vm1, 1.0, %v777_v22  ;;  %vm188_vm2 = vcmp.eq.f32.partialorder %v802_v18, 14.0  ;;  %vm196_vm3 = vcmp.eq.f32.partialorder %v802_v18, 15.0  ;;  %v195_v23 = vpack.c.bf16 %v705_v9, %v705_v9 }
  0xa6   :  { %554 = vmatpush1.bf16.xpose.msra.mxu0 %v919_v10  ;;  %754 = vmatpush1.bf16.xpose.msra.mxu1 %v919_v10  ;;  %v267_v21 = vsel %vm236_vm4, %v131_v15, %v219_v16  ;;  %v235_v27 = vrot.slane %v203_v17, 4  ;;  %v138_v28 = vpack.c.bf16 %v690_v20, %v690_v20  ;;  %v708_v10 = vsel %vm301_vm9, 1.0, %v777_v22 }
  0xa7   :  { %555 = vmatprep.subr.bf16.mxu0 %v922_v11  ;;  %747 = vmatprep.subr.bf16.mxu1 %v922_v11  ;;  %v431_v29 = vrot.slane %v315_v5, 4  ;;  %v704_v30 = vsel %vm188_vm2, 1.0, %v777_v22  ;;  %v706_v18 = vsel %vm196_vm3, 1.0, %v777_v22  ;;  %v130_v11 = vpack.c.bf16 %v688_v19, %v688_v19 }
  0xa8   :  { %v299_v31 = vsel %vm236_vm4, %v195_v23, %v235_v27  ;;  %v218_v33 = vrot.slane %v138_v28, 4  ;;  %v202_v34 = vpack.c.bf16 %v706_v18, %v706_v18  ;;  %v307_v35 = vpack.c.bf16 %v708_v10, %v708_v10 }
  0xa9   :  { %v194_v37 = vpack.c.bf16 %v704_v30, %v704_v30 }
  0xaa   :  { %v263_v36 = vsel %vm236_vm4, %v130_v11, %v218_v33  ;;  %v234_v39 = vrot.slane %v202_v34, 4  ;;  %v463_v25 = vsel %vm236_vm4, %v307_v35, %v431_v29 }
  0xac   :  { %v295_v40 = vsel %vm236_vm4, %v194_v37, %v234_v39 }
  0xae   :  { %556 = vmatpush1.bf16.xpose.msra.mxu0 %v463_v25  ;;  %755 = vmatpush1.bf16.xpose.msra.mxu1 %v463_v25 }
  0xb5   :  { %574 = vmatmul.mubr.bf16.vlgmr.msra.gmra.mxu0 %v926_v13  ;;  %606 = vmatmul.mubr.bf16.vlgmr.msra.gmra.mxu1 %v937_v24 }
  0xb6   :  { %581 = vmatprep.mubr.bf16.mxu0 %v944_v32  ;;  %613 = vmatprep.mubr.bf16.mxu1 %v951_v38 }
  0xbd   :  { %582 = vmatmul.mubr.bf16.gmra.mxu0 %v958_v44  ;;  %614 = vmatmul.mubr.bf16.gmra.mxu1 %v966_v50 }
  0xbe   :  { %589 = vmatprep.mubr.bf16.mxu0 %v259_v56  ;;  %621 = vmatprep.mubr.bf16.mxu1 %v291_v63 }
  0xc5   :  { %590 = vmatmul.mubr.bf16.gmra.mxu0 %v255_v4  ;;  %622 = vmatmul.mubr.bf16.gmra.mxu1 %v287_v14 }
  0xc6   :  { %597 = vmatprep.mubr.bf16.mxu0 %v267_v21  ;;  %629 = vmatprep.mubr.bf16.mxu1 %v299_v31 }
  0xcd   :  { %598 = vmatmul.mubr.bf16.gmra.mxu0 %v263_v36  ;;  %630 = vmatmul.mubr.bf16.gmra.mxu1 %v295_v40 }
 0x175   :  { %v575_v22 = vpop.f32.mrf.mxu0  ;;  %v607_v61 = vpop.f32.mrf.mxu1 }
 0x176   :  { %654 = vst [vmem:[%s1069_s2] sm:$0xff] %v575_v22  ;;  %662 = vst [vmem:[%s1069_s2 + $0x40] sm:$0xff] %v607_v61 }
 0x177   :  { %v577_v5 = vpop.f32.mrf.mxu0  ;;  %v609_v13 = vpop.f32.mrf.mxu1 }
 0x179   :  { %v578_v24 = vpop.f32.mrf.mxu0  ;;  %v610_v32 = vpop.f32.mrf.mxu1 }
 0x17a   :  { %655 = vst [vmem:[%s1069_s2 + $0x8] sm:$0xff] %v578_v24  ;;  %663 = vst [vmem:[%s1069_s2 + $0x48] sm:$0xff] %v610_v32 }
 0x17b   :  { %v580_v38 = vpop.f32.mrf.mxu0  ;;  %v612_v41 = vpop.f32.mrf.mxu1 }
 0x17d   :  { %v583_v42 = vpop.f32.mrf.mxu0  ;;  %v615_v43 = vpop.f32.mrf.mxu1 }
 0x17e   :  { %656 = vst [vmem:[%s1069_s2 + $0x10] sm:$0xff] %v583_v42  ;;  %664 = vst [vmem:[%s1069_s2 + $0x50] sm:$0xff] %v615_v43 }
 0x17f   :  { %v585_v44 = vpop.f32.mrf.mxu0  ;;  %v617_v45 = vpop.f32.mrf.mxu1 }
 0x181   :  { %v586_v46 = vpop.f32.mrf.mxu0  ;;  %v618_v47 = vpop.f32.mrf.mxu1 }
 0x182   :  { %657 = vst [vmem:[%s1069_s2 + $0x18] sm:$0xff] %v586_v46  ;;  %665 = vst [vmem:[%s1069_s2 + $0x58] sm:$0xff] %v618_v47 }
 0x183   :  { %v588_v48 = vpop.f32.mrf.mxu0  ;;  %v620_v49 = vpop.f32.mrf.mxu1 }
 0x185   :  { %v591_v50 = vpop.f32.mrf.mxu0  ;;  %v623_v51 = vpop.f32.mrf.mxu1 }
 0x186   :  { %658 = vst [vmem:[%s1069_s2 + $0x20] sm:$0xff] %v591_v50  ;;  %666 = vst [vmem:[%s1069_s2 + $0x60] sm:$0xff] %v623_v51 }
 0x187   :  { %v593_v52 = vpop.f32.mrf.mxu0  ;;  %v625_v53 = vpop.f32.mrf.mxu1 }
 0x189   :  { %v594_v54 = vpop.f32.mrf.mxu0  ;;  %v626_v55 = vpop.f32.mrf.mxu1 }
 0x18a   :  { %659 = vst [vmem:[%s1069_s2 + $0x28] sm:$0xff] %v594_v54  ;;  %667 = vst [vmem:[%s1069_s2 + $0x68] sm:$0xff] %v626_v55 }
 0x18b   :  { %v596_v56 = vpop.f32.mrf.mxu0  ;;  %v628_v57 = vpop.f32.mrf.mxu1 }
 0x18d   :  { %v599_v58 = vpop.f32.mrf.mxu0  ;;  %v631_v59 = vpop.f32.mrf.mxu1 }
 0x18e   :  { %660 = vst [vmem:[%s1069_s2 + $0x30] sm:$0xff] %v599_v58  ;;  %668 = vst [vmem:[%s1069_s2 + $0x70] sm:$0xff] %v631_v59 }
 0x18f   :  { %v601_v60 = vpop.f32.mrf.mxu0  ;;  %v633_v62 = vpop.f32.mrf.mxu1 }
 0x191   :  { %v602_v63 = vpop.f32.mrf.mxu0  ;;  %v634_v26 = vpop.f32.mrf.mxu1 }
 0x192   :  { %661 = vst [vmem:[%s1069_s2 + $0x38] sm:$0xff] %v602_v63  ;;  %669 = vst [vmem:[%s1069_s2 + $0x78] sm:$0xff] %v634_v26 }
 0x193   :  { %v604_v0 = vpop.f32.mrf.mxu0  ;;  %v636_v1 = vpop.f32.mrf.mxu1 }
 0x194   :  { %674 = vsyncpa [#allocation3], 1 }

// kernel: otsu_threshold.3
= control target key start
LH: loop header
LB: loop body
LE: loop exit
PB: predicated region body
PF: predicated region fallthrough
CT: control target
= control target key end

     0   :  { %v31_v0 = vmov 0   ;;  %s62_s0 = inlined_call_operand.vmem [shape: f32[8,1], index: 0, kind: input, shape index: {}]   ;;  %s63_s1 = inlined_call_operand.vmem [shape: f32[8,256], index: 1, kind: input, shape index: {}]   ;;  %s64_s2 = inlined_call_operand.vmem [shape: f32[8,256], index: 2, kind: output, shape index: {}]  }
   0x1   :  { %30 = vset.pattern.permute.xlu0 %v31_v0  ;;  %v13_v1 = vld [vmem:[%s62_s0] sm:$0xff]  ;;  %v12_v3 = vld [vmem:[%s63_s1 + $0x8] sm:$0xff] }
   0x2   :  { %16 = vperm.xlu0 %30, %v13_v1   ;;  %v11_v2 = vld [vmem:[%s63_s1] sm:$0xff] }
  0x7d   :  { %v17_v4 = vpop.permute.xlu0 %16 }
  0x7e   :  { %vm19_vm0 = vcmp.le.f32.partialorder %v11_v2, %v17_v4  ;;  %vm20_vm1 = vcmp.le.f32.partialorder %v12_v3, %v17_v4 }
  0x7f   :  { %v21_v5 = vsel %vm19_vm0, 0.0, %v11_v2  ;;  %v22_v6 = vsel %vm20_vm1, 0.0, %v12_v3 }
  0x80   :  { %23 = vst [vmem:[%s64_s2] sm:$0xff] %v21_v5  ;;  %24 = vst [vmem:[%s64_s2 + $0x8] sm:$0xff] %v22_v6 }

</bundles_post_ra>
